<compile_context>
chip_gen: v7x
topology: tpu7x:2x2x1
jax: 0.10.0
libtpu: 0.0.40
codegen_flags: <defaults>
</compile_context>

<pallas_src>
import jax
import jax.numpy as jnp
from jax.experimental import pallas as pl
from jax.experimental.pallas import tpu as pltpu

LANE = 128           # lane width: weight feature dims padded to multiples of this
BF16_SUBLANE = 16    # bf16 sublane packing: batch rows padded to multiples of this


def _round_up(x, m):
    return (x + m - 1) // m * m


def muzero_kernel(state_ref, action_ref,
                  w_rep_ref, b_rep_ref,
                  w_dyn_h_ref, w_dyn_a_ref, b_dyn_ref,
                  w_pred_ref, b_pred_ref,
                  next_state_ref, logits_ref,
                  sa_ref):
    S = state_ref.shape[1]           # true state_dim
    A = action_ref.shape[1]          # true action_dim
    H = next_state_ref.shape[1]      # true hidden_dim
    AO = logits_ref.shape[1]         # true action_dim (logits width)

    # Stage [state | action | zeros] into a lane-dense bf16 VMEM buffer at zero
    # HBM cost.  Re-zero every step (a handful of VMEM stores) so padding lanes
    # are never garbage and the scheme stays correct when the parallel batch
    # grid is sharded across TensorCores (v7x megacore).
    sa_ref[...] = jnp.zeros_like(sa_ref)
    sa_ref[:, 0:S] = state_ref[...].astype(jnp.bfloat16)
    sa_ref[:, S:S + A] = action_ref[...].astype(jnp.bfloat16)
    sa = sa_ref[...]

    # representation: latent = relu(state @ W_rep + b_rep)   (bf16 MXU, f32 acc)
    # (w_rep rows outside the state lane range are zero.)
    latent = jnp.dot(sa, w_rep_ref[...],
                     preferred_element_type=jnp.float32) + b_rep_ref[...]
    latent = jnp.maximum(latent, 0.0)

    # dynamics: next = relu(latent @ W_dyn_h + action @ W_dyn_a + b_dyn)
    # Two accumulating matmuls -- no (TB, 256) concat temporary; also the
    # natural form for v5e's 128-deep MXU.
    nxt = (jnp.dot(latent.astype(jnp.bfloat16), w_dyn_h_ref[...],
                   preferred_element_type=jnp.float32)
           + jnp.dot(sa, w_dyn_a_ref[...],
                     preferred_element_type=jnp.float32)
           + b_dyn_ref[...])
    nxt = jnp.maximum(nxt, 0.0)
    nxt_bf = nxt.astype(jnp.bfloat16)

    # prediction: logits = next_state @ W_pred + b_pred
    logits = jnp.dot(nxt_bf, w_pred_ref[...],
                     preferred_element_type=jnp.float32) + b_pred_ref[...]

    # Unpadded-width stores (HBM write traffic minimized; masked stores are
    # absorbed by the mostly-idle vector-store slot).
    next_state_ref[...] = nxt_bf[:, 0:H]
    logits_ref[...] = logits[:, 0:AO].astype(logits_ref.dtype)


def muzero_forward(state, action, params, *, block_b=1024):
    """state: [B, state_dim] f32, action: [B, action_dim] f32
       -> (next_state [B, hidden_dim] bf16, action_logits [B, action_dim] f32)

    next_state is emitted in bf16: it is consumed as bf16 by the prediction
    matmul and by the next MCTS unroll step anyway, and this halves the largest
    HBM traffic term."""
    state_dim, action_dim, hidden_dim = params["dims"]
    SA_pad, H_pad = params["w_rep"].shape

    B = state.shape[0]
    B_pad = _round_up(max(B, 1), BF16_SUBLANE)

    # Tile the batch.  Big tiles amortize per-grid-step overhead; at least two
    # grid steps whenever possible so v7x's two TensorCores both get work
    # (a no-op on single-TC v5e/v6e).
    n_tiles = pl.cdiv(B_pad, block_b)
    if B_pad >= 2 * BF16_SUBLANE:
        n_tiles = max(n_tiles, 2)
    TB = _round_up(pl.cdiv(B_pad, n_tiles), BF16_SUBLANE)
    B_pad = TB * n_tiles

    if B_pad != B:  # row-only padding (no lane padding, no bf16 copy pass)
        state = jnp.pad(state, ((0, B_pad - B), (0, 0)))
        action = jnp.pad(action, ((0, B_pad - B), (0, 0)))

    grid = (n_tiles,)

    def batched(cols):                       # activation tiles: stream over batch
        return pl.BlockSpec((TB, cols), lambda i: (i, 0))

    def resident(arr):                       # weights/biases: VMEM-resident (<200 KiB total)
        return pl.BlockSpec(arr.shape, lambda i: (0, 0))

    # Advisory cost: real (unpadded-feature) work and bytes actually moved.
    flops = 2 * B_pad * (state_dim * hidden_dim
                         + (hidden_dim + action_dim) * hidden_dim
                         + hidden_dim * action_dim)
    bytes_accessed = int(
        B_pad * (state_dim + action_dim) * 4            # f32 inputs
        + B_pad * hidden_dim * 2 + B_pad * action_dim * 4   # bf16/f32 outputs
        + sum(int(params[k].size) * 2 for k in ("w_rep", "w_dyn_h", "w_dyn_a", "w_pred"))
        + sum(int(params[k].size) * 4 for k in ("b_rep", "b_dyn", "b_pred")))

    next_p, logits_p = pl.pallas_call(
        muzero_kernel,
        out_shape=(
            jax.ShapeDtypeStruct((B_pad, hidden_dim), jnp.bfloat16),
            jax.ShapeDtypeStruct((B_pad, action_dim), jnp.float32),
        ),
        grid=grid,
        in_specs=[
            batched(state_dim), batched(action_dim),
            resident(params["w_rep"]), resident(params["b_rep"]),
            resident(params["w_dyn_h"]), resident(params["w_dyn_a"]),
            resident(params["b_dyn"]),
            resident(params["w_pred"]), resident(params["b_pred"]),
        ],
        out_specs=(
            pl.BlockSpec((TB, hidden_dim), lambda i: (i, 0)),
            pl.BlockSpec((TB, action_dim), lambda i: (i, 0)),
        ),
        scratch_shapes=[pltpu.VMEM((TB, SA_pad), jnp.bfloat16)],
        compiler_params=pltpu.CompilerParams(
            dimension_semantics=("parallel",),        # v7x: shard batch over 2 TCs
            vmem_limit_bytes=48 * 1024 * 1024,        # below v7x 64 MiB physical
        ),
        cost_estimate=pl.CostEstimate(
            flops=flops, transcendentals=0, bytes_accessed=bytes_accessed),
    )(state, action,
      params["w_rep"], params["b_rep"],
      params["w_dyn_h"], params["w_dyn_a"], params["b_dyn"],
      params["w_pred"], params["b_pred"])

    if B_pad != B:
        next_p = next_p[:B]
        logits_p = logits_p[:B]
    return next_p, logits_p


def init_params(key, state_dim, action_dim, hidden_dim):
    """nn.Linear-style init (uniform +-1/sqrt(fan_in)); weights stored (in, out),
    zero-padded into 128-lane blocks and cast to bf16.  Biases stay f32.

    The dynamics weight is split: w_dyn_h acts on the latent (rows [0, hidden)),
    w_dyn_a acts on the action, placed at rows [state_dim, state_dim+action_dim)
    to match the kernel's [state | action | zeros] staging layout."""
    SA_pad = _round_up(state_dim + action_dim, LANE)
    H_pad = _round_up(hidden_dim, LANE)
    AO_pad = _round_up(action_dim, LANE)

    ks = jax.random.split(key, 6)

    def linear(wkey, bkey, fan_in, fan_out):
        bound = float(fan_in) ** -0.5
        w = jax.random.uniform(wkey, (fan_in, fan_out), jnp.float32, -bound, bound)
        b = jax.random.uniform(bkey, (fan_out,), jnp.float32, -bound, bound)
        return w, b

    w_rep, b_rep = linear(ks[0], ks[1], state_dim, hidden_dim)
    w_dyn, b_dyn = linear(ks[2], ks[3], hidden_dim + action_dim, hidden_dim)
    w_pred, b_pred = linear(ks[4], ks[5], hidden_dim, action_dim)

    w_rep_p = jnp.zeros((SA_pad, H_pad), jnp.float32).at[:state_dim, :hidden_dim].set(w_rep)
    w_dyn_h_p = jnp.zeros((H_pad, H_pad), jnp.float32).at[:hidden_dim, :hidden_dim].set(
        w_dyn[:hidden_dim])
    w_dyn_a_p = jnp.zeros((SA_pad, H_pad), jnp.float32).at[
        state_dim:state_dim + action_dim, :hidden_dim].set(w_dyn[hidden_dim:])
    w_pred_p = jnp.zeros((H_pad, AO_pad), jnp.float32).at[:hidden_dim, :action_dim].set(w_pred)

    b_rep_p = jnp.zeros((1, H_pad), jnp.float32).at[0, :hidden_dim].set(b_rep)
    b_dyn_p = jnp.zeros((1, H_pad), jnp.float32).at[0, :hidden_dim].set(b_dyn)
    b_pred_p = jnp.zeros((1, AO_pad), jnp.float32).at[0, :action_dim].set(b_pred)

    return {
        "dims": (state_dim, action_dim, hidden_dim),
        "w_rep": w_rep_p.astype(jnp.bfloat16), "b_rep": b_rep_p,
        "w_dyn_h": w_dyn_h_p.astype(jnp.bfloat16),
        "w_dyn_a": w_dyn_a_p.astype(jnp.bfloat16),
        "b_dyn": b_dyn_p,
        "w_pred": w_pred_p.astype(jnp.bfloat16), "b_pred": b_pred_p,
    }


def reference_forward(state, action, params):
    """Pure-JAX reference in unpadded space, mirroring the kernel's mixed
    precision (bf16 operands, f32 accumulation, bf16 next_state output)."""
    sd, ad, hd = params["dims"]

    W_rep = params["w_rep"][:sd, :hd].astype(jnp.float32)
    b_rep = params["b_rep"][0, :hd]
    W_dyn_h = params["w_dyn_h"][:hd, :hd].astype(jnp.float32)
    W_dyn_a = params["w_dyn_a"][sd:sd + ad, :hd].astype(jnp.float32)
    b_dyn = params["b_dyn"][0, :hd]
    W_pred = params["w_pred"][:hd, :ad].astype(jnp.float32)
    b_pred = params["b_pred"][0, :ad]

    s = state.astype(jnp.bfloat16).astype(jnp.float32)
    a = action.astype(jnp.bfloat16).astype(jnp.float32)

    latent = jnp.maximum(s @ W_rep + b_rep, 0.0)
    latent = latent.astype(jnp.bfloat16).astype(jnp.float32)
    nxt = jnp.maximum(latent @ W_dyn_h + a @ W_dyn_a + b_dyn, 0.0)
    nxt_bf = nxt.astype(jnp.bfloat16)
    logits = nxt_bf.astype(jnp.float32) @ W_pred + b_pred
    return nxt_bf, logits


if __name__ == "__main__":
    B, state_dim, action_dim, hidden_dim = 2, 16, 8, 32

    key = jax.random.PRNGKey(0)
    k_state, k_action, k_params = jax.random.split(key, 3)

    state = jax.random.normal(k_state, (B, state_dim), jnp.float32)
    action = jax.random.normal(k_action, (B, action_dim), jnp.float32)
    params = init_params(k_params, state_dim, action_dim, hidden_dim)

    next_state, logits = muzero_forward(state, action, params)
    jax.block_until_ready((next_state, logits))

    ref_next, ref_logits = reference_forward(state, action, params)
    assert next_state.shape == (B, hidden_dim)
    assert logits.shape == (B, action_dim)
    assert jnp.allclose(next_state.astype(jnp.float32), ref_next.astype(jnp.float32),
                        atol=3e-2, rtol=3e-2)
    assert jnp.allclose(logits, ref_logits, atol=3e-2, rtol=3e-2)

    print("KERNEL_OK")
</pallas_src>

<mosaic_0001>
module attributes {stable_mosaic.version = 11 : i64} {
  func.func @muzero_kernel(%arg0: i32, %arg1: memref<16x16xf32, #tpu.memory_space<vmem>>, %arg2: memref<16x8xf32, #tpu.memory_space<vmem>>, %arg3: memref<128x128xbf16, #tpu.memory_space<vmem>>, %arg4: memref<1x128xf32, #tpu.memory_space<vmem>>, %arg5: memref<128x128xbf16, #tpu.memory_space<vmem>>, %arg6: memref<128x128xbf16, #tpu.memory_space<vmem>>, %arg7: memref<1x128xf32, #tpu.memory_space<vmem>>, %arg8: memref<128x128xbf16, #tpu.memory_space<vmem>>, %arg9: memref<1x128xf32, #tpu.memory_space<vmem>>, %arg10: memref<16x32xbf16, #tpu.memory_space<vmem>>, %arg11: memref<16x8xf32, #tpu.memory_space<vmem>>, %arg12: memref<16x128xbf16, #tpu.memory_space<vmem>>) attributes {dimension_semantics = [#tpu.dimension_semantics<parallel>], iteration_bounds = array<i64: 1>, scalar_prefetch = 0 : i64, scratch_operands = 1 : i64, tpu.core_type = #tpu.core_type<tc>, window_params = [{transform_indices = @transform_0, window_bounds = array<i64: 16, 16>}, {transform_indices = @transform_1, window_bounds = array<i64: 16, 8>}, {pipeline_mode = #tpu.pipeline_mode<synchronous>, transform_indices = @transform_2, window_bounds = array<i64: 128, 128>}, {pipeline_mode = #tpu.pipeline_mode<synchronous>, transform_indices = @transform_3, window_bounds = array<i64: 1, 128>}, {pipeline_mode = #tpu.pipeline_mode<synchronous>, transform_indices = @transform_4, window_bounds = array<i64: 128, 128>}, {pipeline_mode = #tpu.pipeline_mode<synchronous>, transform_indices = @transform_5, window_bounds = array<i64: 128, 128>}, {pipeline_mode = #tpu.pipeline_mode<synchronous>, transform_indices = @transform_6, window_bounds = array<i64: 1, 128>}, {pipeline_mode = #tpu.pipeline_mode<synchronous>, transform_indices = @transform_7, window_bounds = array<i64: 128, 128>}, {pipeline_mode = #tpu.pipeline_mode<synchronous>, transform_indices = @transform_8, window_bounds = array<i64: 1, 128>}, {transform_indices = @transform_9, window_bounds = array<i64: 16, 32>}, {transform_indices = @transform_10, window_bounds = array<i64: 16, 8>}]} {
    %cst = arith.constant 0.000000e+00 : bf16
    %0 = vector.broadcast %cst : bf16 to vector<16x128xbf16>
    %c0 = arith.constant 0 : index
    %c0_0 = arith.constant 0 : index
    %1 = vector.load %arg12[%c0, %c0_0] : memref<16x128xbf16, #tpu.memory_space<vmem>>, vector<16x128xbf16>
    tpu.vector_store %arg12[%c0, %c0_0], %0 {strides = array<i32>} : memref<16x128xbf16, #tpu.memory_space<vmem>>, vector<16x128xbf16>,
    %c0_1 = arith.constant 0 : index
    %c0_2 = arith.constant 0 : index
    %2 = vector.load %arg1[%c0_1, %c0_2] : memref<16x16xf32, #tpu.memory_space<vmem>>, vector<16x16xf32>
    %3 = arith.truncf %2 : vector<16x16xf32> to vector<16x16xbf16>
    %c0_3 = arith.constant 0 : index
    %c0_4 = arith.constant 0 : index
    %4 = vector.load %arg12[%c0_3, %c0_4] : memref<16x128xbf16, #tpu.memory_space<vmem>>, vector<16x16xbf16>
    tpu.vector_store %arg12[%c0_3, %c0_4], %3 {strides = array<i32>} : memref<16x128xbf16, #tpu.memory_space<vmem>>, vector<16x16xbf16>,
    %c0_5 = arith.constant 0 : index
    %c0_6 = arith.constant 0 : index
    %5 = vector.load %arg2[%c0_5, %c0_6] : memref<16x8xf32, #tpu.memory_space<vmem>>, vector<16x8xf32>
    %6 = arith.truncf %5 : vector<16x8xf32> to vector<16x8xbf16>
    %c0_7 = arith.constant 0 : index
    %c16 = arith.constant 16 : index
    %7 = vector.load %arg12[%c0_7, %c16] : memref<16x128xbf16, #tpu.memory_space<vmem>>, vector<16x8xbf16>
    tpu.vector_store %arg12[%c0_7, %c16], %6 {strides = array<i32>} : memref<16x128xbf16, #tpu.memory_space<vmem>>, vector<16x8xbf16>,
    %c0_8 = arith.constant 0 : index
    %c0_9 = arith.constant 0 : index
    %8 = vector.load %arg12[%c0_8, %c0_9] : memref<16x128xbf16, #tpu.memory_space<vmem>>, vector<16x128xbf16>
    %c0_10 = arith.constant 0 : index
    %c0_11 = arith.constant 0 : index
    %9 = vector.load %arg3[%c0_10, %c0_11] : memref<128x128xbf16, #tpu.memory_space<vmem>>, vector<128x128xbf16>
    %cst_12 = arith.constant dense<0.000000e+00> : vector<16x128xf32>
    %10 = tpu.matmul %8, %9, %cst_12 {dimension_numbers = #tpu.dot_dimension_numbers<[1], [0], [0], [1], [0, 0, 1, 1], [], []>} : vector<16x128xbf16>, vector<128x128xbf16>, vector<16x128xf32> -> vector<16x128xf32>
    %c0_13 = arith.constant 0 : index
    %c0_14 = arith.constant 0 : index
    %11 = vector.load %arg4[%c0_13, %c0_14] : memref<1x128xf32, #tpu.memory_space<vmem>>, vector<1x128xf32>
    %12 = vector.broadcast %11 : vector<1x128xf32> to vector<16x128xf32>
    %13 = arith.addf %10, %12 : vector<16x128xf32>
    %cst_15 = arith.constant 0.000000e+00 : f32
    %14 = vector.broadcast %cst_15 : f32 to vector<16x128xf32>
    %15 = arith.maximumf %13, %14 : vector<16x128xf32>
    %16 = arith.truncf %15 : vector<16x128xf32> to vector<16x128xbf16>
    %c0_16 = arith.constant 0 : index
    %c0_17 = arith.constant 0 : index
    %17 = vector.load %arg5[%c0_16, %c0_17] : memref<128x128xbf16, #tpu.memory_space<vmem>>, vector<128x128xbf16>
    %cst_18 = arith.constant dense<0.000000e+00> : vector<16x128xf32>
    %18 = tpu.matmul %16, %17, %cst_18 {dimension_numbers = #tpu.dot_dimension_numbers<[1], [0], [0], [1], [0, 0, 1, 1], [], []>} : vector<16x128xbf16>, vector<128x128xbf16>, vector<16x128xf32> -> vector<16x128xf32>
    %c0_19 = arith.constant 0 : index
    %c0_20 = arith.constant 0 : index
    %19 = vector.load %arg6[%c0_19, %c0_20] : memref<128x128xbf16, #tpu.memory_space<vmem>>, vector<128x128xbf16>
    %cst_21 = arith.constant dense<0.000000e+00> : vector<16x128xf32>
    %20 = tpu.matmul %8, %19, %cst_21 {dimension_numbers = #tpu.dot_dimension_numbers<[1], [0], [0], [1], [0, 0, 1, 1], [], []>} : vector<16x128xbf16>, vector<128x128xbf16>, vector<16x128xf32> -> vector<16x128xf32>
    %21 = arith.addf %18, %20 : vector<16x128xf32>
    %c0_22 = arith.constant 0 : index
    %c0_23 = arith.constant 0 : index
    %22 = vector.load %arg7[%c0_22, %c0_23] : memref<1x128xf32, #tpu.memory_space<vmem>>, vector<1x128xf32>
    %23 = vector.broadcast %22 : vector<1x128xf32> to vector<16x128xf32>
    %24 = arith.addf %21, %23 : vector<16x128xf32>
    %cst_24 = arith.constant 0.000000e+00 : f32
    %25 = vector.broadcast %cst_24 : f32 to vector<16x128xf32>
    %26 = arith.maximumf %24, %25 : vector<16x128xf32>
    %27 = arith.truncf %26 : vector<16x128xf32> to vector<16x128xbf16>
    %c0_25 = arith.constant 0 : index
    %c0_26 = arith.constant 0 : index
    %28 = vector.load %arg8[%c0_25, %c0_26] : memref<128x128xbf16, #tpu.memory_space<vmem>>, vector<128x128xbf16>
    %cst_27 = arith.constant dense<0.000000e+00> : vector<16x128xf32>
    %29 = tpu.matmul %27, %28, %cst_27 {dimension_numbers = #tpu.dot_dimension_numbers<[1], [0], [0], [1], [0, 0, 1, 1], [], []>} : vector<16x128xbf16>, vector<128x128xbf16>, vector<16x128xf32> -> vector<16x128xf32>
    %c0_28 = arith.constant 0 : index
    %c0_29 = arith.constant 0 : index
    %30 = vector.load %arg9[%c0_28, %c0_29] : memref<1x128xf32, #tpu.memory_space<vmem>>, vector<1x128xf32>
    %31 = vector.broadcast %30 : vector<1x128xf32> to vector<16x128xf32>
    %32 = arith.addf %29, %31 : vector<16x128xf32>
    %33 = vector.extract_strided_slice %27 {offsets = [0, 0], sizes = [16, 32], strides = [1, 1]} : vector<16x128xbf16> to vector<16x32xbf16>
    %c0_30 = arith.constant 0 : index
    %c0_31 = arith.constant 0 : index
    %34 = vector.load %arg10[%c0_30, %c0_31] : memref<16x32xbf16, #tpu.memory_space<vmem>>, vector<16x32xbf16>
    tpu.vector_store %arg10[%c0_30, %c0_31], %33 {strides = array<i32>} : memref<16x32xbf16, #tpu.memory_space<vmem>>, vector<16x32xbf16>,
    %35 = vector.extract_strided_slice %32 {offsets = [0, 0], sizes = [16, 8], strides = [1, 1]} : vector<16x128xf32> to vector<16x8xf32>
    %c0_32 = arith.constant 0 : index
    %c0_33 = arith.constant 0 : index
    %36 = vector.load %arg11[%c0_32, %c0_33] : memref<16x8xf32, #tpu.memory_space<vmem>>, vector<16x8xf32>
    tpu.vector_store %arg11[%c0_32, %c0_33], %35 {strides = array<i32>} : memref<16x8xf32, #tpu.memory_space<vmem>>, vector<16x8xf32>,
    return
  }
  func.func @transform_0(%arg0: i32) -> (i32, i32) {
    %c0_i32 = arith.constant 0 : i32
    %c0_i32_0 = arith.constant 0 : i32
    return %arg0, %c0_i32 : i32, i32
  }
  func.func @transform_1(%arg0: i32) -> (i32, i32) {
    %c0_i32 = arith.constant 0 : i32
    %c0_i32_0 = arith.constant 0 : i32
    return %arg0, %c0_i32 : i32, i32
  }
  func.func @transform_2(%arg0: i32) -> (i32, i32) {
    %c0_i32 = arith.constant 0 : i32
    %c0_i32_0 = arith.constant 0 : i32
    %c0_i32_1 = arith.constant 0 : i32
    return %c0_i32, %c0_i32_0 : i32, i32
  }
  func.func @transform_3(%arg0: i32) -> (i32, i32) {
    %c0_i32 = arith.constant 0 : i32
    %c0_i32_0 = arith.constant 0 : i32
    %c0_i32_1 = arith.constant 0 : i32
    return %c0_i32, %c0_i32_0 : i32, i32
  }
  func.func @transform_4(%arg0: i32) -> (i32, i32) {
    %c0_i32 = arith.constant 0 : i32
    %c0_i32_0 = arith.constant 0 : i32
    %c0_i32_1 = arith.constant 0 : i32
    return %c0_i32, %c0_i32_0 : i32, i32
  }
  func.func @transform_5(%arg0: i32) -> (i32, i32) {
    %c0_i32 = arith.constant 0 : i32
    %c0_i32_0 = arith.constant 0 : i32
    %c0_i32_1 = arith.constant 0 : i32
    return %c0_i32, %c0_i32_0 : i32, i32
  }
  func.func @transform_6(%arg0: i32) -> (i32, i32) {
    %c0_i32 = arith.constant 0 : i32
    %c0_i32_0 = arith.constant 0 : i32
    %c0_i32_1 = arith.constant 0 : i32
    return %c0_i32, %c0_i32_0 : i32, i32
  }
  func.func @transform_7(%arg0: i32) -> (i32, i32) {
    %c0_i32 = arith.constant 0 : i32
    %c0_i32_0 = arith.constant 0 : i32
    %c0_i32_1 = arith.constant 0 : i32
    return %c0_i32, %c0_i32_0 : i32, i32
  }
  func.func @transform_8(%arg0: i32) -> (i32, i32) {
    %c0_i32 = arith.constant 0 : i32
    %c0_i32_0 = arith.constant 0 : i32
    %c0_i32_1 = arith.constant 0 : i32
    return %c0_i32, %c0_i32_0 : i32, i32
  }
  func.func @transform_9(%arg0: i32) -> (i32, i32) {
    %c0_i32 = arith.constant 0 : i32
    %c0_i32_0 = arith.constant 0 : i32
    return %arg0, %c0_i32 : i32, i32
  }
  func.func @transform_10(%arg0: i32) -> (i32, i32) {
    %c0_i32 = arith.constant 0 : i32
    %c0_i32_0 = arith.constant 0 : i32
    return %arg0, %c0_i32 : i32, i32
  }
}

</mosaic_0001>

<bundles_post_ra>
// kernel: tpu_custom_call.1
= control target key start
LH: loop header
LB: loop body
LE: loop exit
PB: predicated region body
PF: predicated region fallthrough
CT: control target
= control target key end

     0   :  { %16 = vsyncpa [#allocation4], 0  ;;  %s1130_s0 = inlined_call_operand.vmem [shape: f32[16,16], index: 0, kind: input, shape index: {}]   ;;  %s1131_s1 = inlined_call_operand.vmem [shape: f32[16,8], index: 1, kind: input, shape index: {}]   ;;  %s1132_s2 = inlined_call_operand.hbm [shape: bf16[128,128], index: 2, kind: input, shape index: {}]   ;;  %s1133_s3 = inlined_call_operand.vmem [shape: f32[1,128], index: 3, kind: input, shape index: {}]   ;;  %s1134_s4 = inlined_call_operand.hbm [shape: bf16[128,128], index: 4, kind: input, shape index: {}]   ;;  %s1135_s5 = inlined_call_operand.hbm [shape: bf16[128,128], index: 5, kind: input, shape index: {}]   ;;  %s1136_s6 = inlined_call_operand.vmem [shape: f32[1,128], index: 6, kind: input, shape index: {}]   ;;  %s1137_s7 = inlined_call_operand.hbm [shape: bf16[128,128], index: 7, kind: input, shape index: {}]   ;;  %s1138_s8 = inlined_call_operand.vmem [shape: f32[1,128], index: 8, kind: input, shape index: {}]   ;;  %s1139_s9 = inlined_call_operand.hbm [shape: bf16[16,32], index: 9, kind: output, shape index: {0}]   ;;  %s1140_s10 = inlined_call_operand.vmem [shape: f32[16,8], index: 10, kind: output, shape index: {1}]  }
   0x1   :  { %17 = vsyncpa [#allocation7], 0 }
   0x2   :  { %18 = vsyncpa [#allocation10], 0 }
   0x3   :  { %19 = vsyncpa [#allocation5], 0  ;;  %s908_s13 = smov [#allocation6]   ;;  %s909_s15 = smov [#allocation3]  }
   0x4   :  { %s43_s14 = sshll.u32 %s908_s13, 4  ;;  %s29_s16 = sshll.u32 %s909_s15, 4  ;;  %s44_s14 = int_to_ptr.vmem [resolvable:$true] %s43_s14  ;;  %s974_s16 = int_to_ptr.vmem [resolvable:$true] %s29_s16 }
   0x5   :  { %s790_s19 = scalar_lea.hbm %s1134_s4, 1024 }
   0x6   :  { %p791_p0 = scmp.ne.s32.totalorder %s1134_s4, %s790_s19  ;;  %p794_p1 = scmp.lt.u32.totalorder %s790_s19, %s1134_s4 }
   0x8   :  { %p796_p2 = pnand %p794_p1, %p791_p0 }
   0xa   :  { %799 = shalt.err (!%p796_p2)
}
   0xb   :  { %s800_s24 = scalar_lea.vmem %s44_s14, 1024  ;;  %p805_p4 = scmp.lt.s32.totalorder %s44_s14, %s44_s14 }
   0xc   :  { %p801_p3 = scmp.ne.s32.totalorder %s44_s14, %s800_s24  ;;  %p806_p5 = scmp.lt.s32.totalorder %s800_s24, %s800_s24 }
   0xe   :  { %p807_p6 = por %p806_p5, %p805_p4 }
  0x10   :  { %p808_p7 = pnand %p807_p6, %p801_p3 }
  0x12   :  { %811 = shalt.err (!%p808_p7)
}
  0x13   :  { %s910_s25 = smov 64   ;;  %s911_s26 = smov 4  }
  0x14   :  { %49 = dma.hbm_to_vmem [thread:$0]  %s1134_s4, 1024, %s44_s14, [#allocation7], %s910_s25, %s910_s25, %s911_s26  }
  0x15   :  { %s812_s11 = scalar_lea.hbm %s1132_s2, 1024 }
  0x16   :  { %p813_p8 = scmp.ne.s32.totalorder %s1132_s2, %s812_s11  ;;  %p816_p9 = scmp.lt.u32.totalorder %s812_s11, %s1132_s2 }
  0x18   :  { %p818_p10 = pnand %p816_p9, %p813_p8 }
  0x1a   :  { %821 = shalt.err (!%p818_p10)
}
  0x1b   :  { %s822_s18 = scalar_lea.vmem %s974_s16, 1024  ;;  %p827_p12 = scmp.lt.s32.totalorder %s974_s16, %s974_s16 }
  0x1c   :  { %p823_p11 = scmp.ne.s32.totalorder %s974_s16, %s822_s18  ;;  %p828_p13 = scmp.lt.s32.totalorder %s822_s18, %s822_s18 }
  0x1e   :  { %p829_p0 = por %p828_p13, %p827_p12 }
  0x20   :  { %p830_p1 = pnand %p829_p0, %p823_p11 }
  0x22   :  { %833 = shalt.err (!%p830_p1)
}
  0x23   :  { %35 = dma.hbm_to_vmem [thread:$0]  %s1132_s2, 1024, %s974_s16, [#allocation4], %s910_s25, %s910_s25, %s911_s26  }
  0x24   :  { %s912_s19 = smov [#allocation8]   ;;  %s913_s21 = smov [#allocation9]  }
  0x25   :  { %s55_s20 = sshll.u32 %s912_s19, 4  ;;  %s69_s22 = sshll.u32 %s913_s21, 4  ;;  %s56_s20 = int_to_ptr.vmem [resolvable:$true] %s55_s20  ;;  %s1011_s22 = int_to_ptr.vmem [resolvable:$true] %s69_s22 }
  0x26   :  { %s834_s27 = scalar_lea.hbm %s1135_s5, 1024 }
  0x27   :  { %p835_p2 = scmp.ne.s32.totalorder %s1135_s5, %s834_s27  ;;  %p838_p3 = scmp.lt.u32.totalorder %s834_s27, %s1135_s5 }
  0x29   :  { %p840_p4 = pnand %p838_p3, %p835_p2 }
  0x2b   :  { %843 = shalt.err (!%p840_p4)
}
  0x2c   :  { %s844_s2 = scalar_lea.vmem %s56_s20, 1024  ;;  %p849_p6 = scmp.lt.s32.totalorder %s56_s20, %s56_s20 }
  0x2d   :  { %p845_p5 = scmp.ne.s32.totalorder %s56_s20, %s844_s2  ;;  %p850_p7 = scmp.lt.s32.totalorder %s844_s2, %s844_s2 }
  0x2f   :  { %p851_p8 = por %p850_p7, %p849_p6 }
  0x31   :  { %p852_p9 = pnand %p851_p8, %p845_p5 }
  0x33   :  { %855 = shalt.err (!%p852_p9)
}
  0x34   :  { %61 = dma.hbm_to_vmem [thread:$0]  %s1135_s5, 1024, %s56_s20, [#allocation7], %s910_s25, %s910_s25, %s911_s26  }
  0x35   :  { %s856_s17 = scalar_lea.hbm %s1137_s7, 1024 }
  0x36   :  { %p857_p10 = scmp.ne.s32.totalorder %s1137_s7, %s856_s17  ;;  %p860_p11 = scmp.lt.u32.totalorder %s856_s17, %s1137_s7 }
  0x38   :  { %p862_p12 = pnand %p860_p11, %p857_p10 }
  0x3a   :  { %865 = shalt.err (!%p862_p12)
}
  0x3b   :  { %s866_s21 = scalar_lea.vmem %s1011_s22, 1024  ;;  %p871_p0 = scmp.lt.s32.totalorder %s1011_s22, %s1011_s22 }
  0x3c   :  { %p867_p13 = scmp.ne.s32.totalorder %s1011_s22, %s866_s21  ;;  %p872_p1 = scmp.lt.s32.totalorder %s866_s21, %s866_s21 }
  0x3e   :  { %p873_p2 = por %p872_p1, %p871_p0 }
  0x40   :  { %p874_p3 = pnand %p873_p2, %p867_p13 }
  0x42   :  { %877 = shalt.err (!%p874_p3)
}
  0x43   :  { %75 = dma.hbm_to_vmem [thread:$0]  %s1137_s7, 1024, %s1011_s22, [#allocation10], %s910_s25, %s910_s25, %s911_s26  }
  0x44   :  { %900 = dma.done.wait [#allocation4], 1024  }
  0x45   :  { %901 = vsyncadd [#allocation4], 4294966272 }
  0x46   :  { %902 = dma.done.wait [#allocation7], 2048  }
  0x47   :  { %903 = vsyncadd [#allocation7], 4294965248 }
  0x48   :  { %904 = dma.done.wait [#allocation10], 1024  }
  0x49   :  { %905 = vsyncadd [#allocation10], 4294966272  ;;  %v914_v0 = vmov 0.0   ;;  %v915_v1 = vmov 0   ;;  %vm916_vm0 = vmmov 0   ;;  %v97_v2 = vld [vmem:[%s1131_s1] sm:$0xff] }
  0x4a   :  { %667 = vmatprep.subr.bf16.mxu0 %v914_v0  ;;  %687 = vmatprep.subr.bf16.mxu1 %v914_v0  ;;  %91 = vst [vmem:[#allocation2] sm:$0xff] %v915_v1  ;;  %v98_v3 = vld [vmem:[%s1131_s1 + $0x8] sm:$0xff]  ;;  %s917_s27 = smov 16   ;;  %v760_v7 = vld [vmem:[#allocation3 + $0x8] sm:$0xff]   ;;  %v762_v9 = vld [vmem:[#allocation3 + $0x10] sm:$0xff]   ;;  %vm95_vm1 = vcmask 130048  }
  0x4b   :  { %683 = vmatprep.mubr.msk.bf16.mxu0 %vm916_vm0, %v914_v0  ;;  %703 = vmatprep.mubr.msk.bf16.mxu1 %vm916_vm0, %v914_v0  ;;  %v99_v4 = vpack.c.bf16 %v98_v3, %v97_v2  ;;  %v758_v5 = vld [vmem:[#allocation3] sm:$0xff]   ;;  %v761_v8 = vld [vmem:[#allocation8 + $0x8] sm:$0xff]   ;;  %v763_v10 = vld [vmem:[#allocation8 + $0x10] sm:$0xff]   ;;  %vm104_vm2 = vcmask 195712   ;;  %vm563_vm3 = vcmask 257024   ;;  %s918_s16 = smov [#allocation11]  }
  0x4c   :  { %v759_v6 = vld [vmem:[#allocation8] sm:$0xff]   ;;  %668 = vmatpush3.bf16.msra.mxu0 %v758_v5  ;;  %v764_v11 = vld [vmem:[#allocation3 + $0x18] sm:$0xff]   ;;  %v768_v18 = vld [vmem:[#allocation3 + $0x28] sm:$0xff]   ;;  %s574_s12 = sshll.u32 %s918_s16, 4  ;;  %s575_s12 = int_to_ptr.vmem [resolvable:$true] %s574_s12 }
  0x4d   :  { %101 = vrot.lane.b32.xlu0 %v99_v4, %s917_s27  ;;  %688 = vmatpush3.bf16.msra.mxu1 %v759_v6  ;;  %v765_v12 = vld [vmem:[#allocation8 + $0x18] sm:$0xff]   ;;  %v93_v14 = vld [vmem:[%s1130_s0 + $0x8] sm:$0xff]  ;;  %v769_v19 = vld [vmem:[#allocation8 + $0x28] sm:$0xff]   ;;  %p883_p5 = scmp.lt.s32.totalorder %s575_s12, %s575_s12 }
  0x4e   :  { %669 = vmatprep.subr.bf16.mxu0 %v914_v0  ;;  %689 = vmatprep.subr.bf16.mxu1 %v914_v0  ;;  %v92_v13 = vld [vmem:[%s1130_s0] sm:$0xff]  ;;  %v766_v16 = vld [vmem:[#allocation3 + $0x20] sm:$0xff]   ;;  %v770_v20 = vld [vmem:[#allocation3 + $0x30] sm:$0xff]  }
  0x4f   :  { %v94_v15 = vpack.c.bf16 %v93_v14, %v92_v13  ;;  %v767_v17 = vld [vmem:[#allocation8 + $0x20] sm:$0xff]   ;;  %v771_v21 = vld [vmem:[#allocation8 + $0x30] sm:$0xff]   ;;  %v772_v22 = vld [vmem:[#allocation3 + $0x38] sm:$0xff]  }
  0x50   :  { %670 = vmatpush3.bf16.msra.mxu0 %v760_v7  ;;  %v773_v23 = vld [vmem:[#allocation8 + $0x38] sm:$0xff]   ;;  %v774_v25 = vld [vmem:[#allocation6] sm:$0xff]   ;;  %v775_v27 = vld [vmem:[#allocation6 + $0x8] sm:$0xff]  }
  0x51   :  { %690 = vmatpush3.bf16.msra.mxu1 %v761_v8  ;;  %671 = vmatprep.subr.bf16.mxu0 %v914_v0  ;;  %96 = vst.msk [vmem:[#allocation2] sm:$0xff] %vm95_vm1, %v94_v15  ;;  %v776_v28 = vld [vmem:[#allocation6 + $0x10] sm:$0xff]   ;;  %v777_v29 = vld [vmem:[#allocation6 + $0x18] sm:$0xff]   ;;  %v778_v30 = vld [vmem:[#allocation6 + $0x20] sm:$0xff]  }
  0x52   :  { %691 = vmatprep.subr.bf16.mxu1 %v914_v0  ;;  %v779_v31 = vld [vmem:[#allocation6 + $0x28] sm:$0xff]   ;;  %v780_v32 = vld [vmem:[#allocation6 + $0x30] sm:$0xff]   ;;  %v781_v33 = vld [vmem:[#allocation6 + $0x38] sm:$0xff]  }
  0x53   :  { %v782_v34 = vld [vmem:[#allocation9] sm:$0xff]   ;;  %v783_v35 = vld [vmem:[#allocation9 + $0x8] sm:$0xff]   ;;  %v784_v36 = vld [vmem:[#allocation9 + $0x10] sm:$0xff]  }
  0x54   :  { %672 = vmatpush3.bf16.msra.mxu0 %v762_v9  ;;  %v785_v37 = vld [vmem:[#allocation9 + $0x18] sm:$0xff]   ;;  %v786_v38 = vld [vmem:[#allocation9 + $0x20] sm:$0xff]   ;;  %v787_v53 = vld [vmem:[#allocation9 + $0x28] sm:$0xff]  }
  0x55   :  { %692 = vmatpush3.bf16.msra.mxu1 %v763_v10  ;;  %673 = vmatprep.subr.bf16.mxu0 %v914_v0  ;;  %v592_v39 = vld [vmem:[%s1133_s3] ss:$0 sm:$0xff]  ;;  %v788_v54 = vld [vmem:[#allocation9 + $0x30] sm:$0xff]  }
  0x56   :  { %693 = vmatprep.subr.bf16.mxu1 %v914_v0  ;;  %v789_v55 = vld [vmem:[#allocation9 + $0x38] sm:$0xff]  }
  0x57   :  { %v617_v57 = vld [vmem:[%s1136_s6] ss:$0 sm:$0xff]  ;;  %s878_s6 = scalar_lea.vmem %s575_s12, 128 }
  0x58   :  { %674 = vmatpush3.bf16.msra.mxu0 %v764_v11  ;;  %p879_p4 = scmp.ne.s32.totalorder %s575_s12, %s878_s6  ;;  %p884_p6 = scmp.lt.s32.totalorder %s878_s6, %s878_s6 }
  0x59   :  { %694 = vmatpush3.bf16.msra.mxu1 %v765_v12  ;;  %675 = vmatprep.subr.bf16.mxu0 %v914_v0 }
  0x5a   :  { %695 = vmatprep.subr.bf16.mxu1 %v914_v0  ;;  %p885_p7 = por %p884_p6, %p883_p5 }
  0x5c   :  { %676 = vmatpush3.bf16.msra.mxu0 %v766_v16  ;;  %p886_p8 = pnand %p885_p7, %p879_p4 }
  0x5d   :  { %696 = vmatpush3.bf16.msra.mxu1 %v767_v17  ;;  %677 = vmatprep.subr.bf16.mxu0 %v914_v0 }
  0x5e   :  { %697 = vmatprep.subr.bf16.mxu1 %v914_v0 }
  0x60   :  { %678 = vmatpush3.bf16.msra.mxu0 %v768_v18 }
  0x61   :  { %698 = vmatpush3.bf16.msra.mxu1 %v769_v19  ;;  %679 = vmatprep.subr.bf16.mxu0 %v914_v0 }
  0x62   :  { %699 = vmatprep.subr.bf16.mxu1 %v914_v0 }
  0x64   :  { %680 = vmatpush3.bf16.msra.mxu0 %v770_v20 }
  0x65   :  { %700 = vmatpush3.bf16.msra.mxu1 %v771_v21  ;;  %681 = vmatprep.subr.bf16.mxu0 %v914_v0 }
  0x66   :  { %701 = vmatprep.subr.bf16.mxu1 %v914_v0 }
  0x68   :  { %682 = vmatpush3.bf16.msra.mxu0 %v772_v22 }
  0x69   :  { %702 = vmatpush3.bf16.msra.mxu1 %v773_v23  ;;  %707 = vmatprep.subr.bf16.mxu0 %v914_v0 }
  0x6a   :  { %727 = vmatprep.subr.bf16.mxu1 %v914_v0 }
  0xbf   :  { %v102_v24 = vpop.permute.xlu0 %101 }
  0xc0   :  { %105 = vst.msk [vmem:[#allocation2] sm:$0xff] %vm104_vm2, %v102_v24 }
  0xc7   :  { %v106_v26 = vld [vmem:[#allocation2] sm:$0xff] }
  0xc8   :  { %684 = vmatmul.mubr.bf16.vlgmr.msra.gmra.mrb[0].mxu0 %v106_v26  ;;  %704 = vmatmul.mubr.bf16.vlgmr.msra.gmra.mrb[0].mxu1 %v106_v26 }
  0xc9   :  { %708 = vmatpush3.bf16.msra.mxu0 %v774_v25  ;;  %723 = vmatprep.mubr.msk.bf16.mxu0 %vm916_vm0, %v914_v0 }
  0xca   :  { %709 = vmatprep.subr.bf16.mxu0 %v914_v0  ;;  %743 = vmatprep.mubr.msk.bf16.mxu1 %vm916_vm0, %v914_v0 }
  0xcb   :  { %728 = vmatpush3.bf16.msra.mxu1 %v782_v34 }
  0xcc   :  { %729 = vmatprep.subr.bf16.mxu1 %v914_v0 }
  0xcd   :  { %710 = vmatpush3.bf16.msra.mxu0 %v775_v27 }
  0xce   :  { %711 = vmatprep.subr.bf16.mxu0 %v914_v0 }
  0xcf   :  { %730 = vmatpush3.bf16.msra.mxu1 %v783_v35 }
  0xd0   :  { %731 = vmatprep.subr.bf16.mxu1 %v914_v0 }
  0xd1   :  { %712 = vmatpush3.bf16.msra.mxu0 %v776_v28 }
  0xd2   :  { %713 = vmatprep.subr.bf16.mxu0 %v914_v0 }
  0xd3   :  { %732 = vmatpush3.bf16.msra.mxu1 %v784_v36 }
  0xd4   :  { %733 = vmatprep.subr.bf16.mxu1 %v914_v0 }
  0xd5   :  { %714 = vmatpush3.bf16.msra.mxu0 %v777_v29 }
  0xd6   :  { %715 = vmatprep.subr.bf16.mxu0 %v914_v0 }
  0xd7   :  { %734 = vmatpush3.bf16.msra.mxu1 %v785_v37 }
  0xd8   :  { %735 = vmatprep.subr.bf16.mxu1 %v914_v0 }
  0xd9   :  { %716 = vmatpush3.bf16.msra.mxu0 %v778_v30 }
  0xda   :  { %717 = vmatprep.subr.bf16.mxu0 %v914_v0 }
  0xdb   :  { %736 = vmatpush3.bf16.msra.mxu1 %v786_v38 }
  0xdc   :  { %737 = vmatprep.subr.bf16.mxu1 %v914_v0 }
  0xdd   :  { %718 = vmatpush3.bf16.msra.mxu0 %v779_v31 }
  0xde   :  { %719 = vmatprep.subr.bf16.mxu0 %v914_v0 }
  0xdf   :  { %738 = vmatpush3.bf16.msra.mxu1 %v787_v53 }
  0xe0   :  { %739 = vmatprep.subr.bf16.mxu1 %v914_v0 }
  0xe1   :  { %720 = vmatpush3.bf16.msra.mxu0 %v780_v32 }
  0xe2   :  { %721 = vmatprep.subr.bf16.mxu0 %v914_v0 }
  0xe3   :  { %740 = vmatpush3.bf16.msra.mxu1 %v788_v54 }
  0xe4   :  { %741 = vmatprep.subr.bf16.mxu1 %v914_v0 }
  0xe5   :  { %722 = vmatpush3.bf16.msra.mxu0 %v781_v33 }
  0xe7   :  { %742 = vmatpush3.bf16.msra.mxu1 %v789_v55 }
 0x19b   :  { %v212_v40 = vpop.f32.mrb[0].mxu0  ;;  %v336_v41 = vpop.f32.mrb[0].mxu1 }
 0x19c   :  { %v213_v42 = vadd.f32 %v592_v39, %v212_v40  ;;  %v685_v43 = vpop.f32.mrb[1].mxu0  ;;  %v705_v44 = vpop.f32.mrb[1].mxu1 }
 0x19d   :  { %v215_v45 = vpop.f32.mrb[2].mxu0  ;;  %v339_v46 = vpop.f32.mrb[2].mxu1 }
 0x19e   :  { %v216_v47 = vadd.f32 %v592_v39, %v215_v45  ;;  %v686_v48 = vpop.f32.mrb[3].mxu0  ;;  %v706_v49 = vpop.f32.mrb[3].mxu1  ;;  %v219_v50 = vmax.f32 %v213_v42, 0.0 }
 0x1a0   :  { %v220_v51 = vmax.f32 %v216_v47, 0.0 }
 0x1a2   :  { %v221_v52 = vpack.c.bf16 %v220_v51, %v219_v50 }
 0x1a4   :  { %724 = vmatmul.mubr.bf16.vlgmr.msra.gmra.mrb[4].mxu0 %v221_v52 }
 0x277   :  { %v425_v56 = vpop.f32.mrb[4].mxu0 }
 0x278   :  { %v426_v58 = vadd.f32 %v425_v56, %v336_v41  ;;  %v725_v59 = vpop.f32.mrb[5].mxu0 }
 0x279   :  { %v428_v60 = vpop.f32.mrb[6].mxu0 }
 0x27a   :  { %v439_v61 = vadd.f32 %v617_v57, %v426_v58  ;;  %v429_v62 = vadd.f32 %v428_v60, %v339_v46  ;;  %v726_v63 = vpop.f32.mrb[7].mxu0 }
 0x27c   :  { %v441_v1 = vmax.f32 %v439_v61, 0.0  ;;  %v440_v2 = vadd.f32 %v617_v57, %v429_v62 }
 0x27e   :  { %v629_v3 = vpack.c.bf16 %v441_v1, %v441_v1  ;;  %v442_v4 = vmax.f32 %v440_v2, 0.0 }
 0x280   :  { %v443_v5 = vpack.c.bf16 %v442_v4, %v441_v1  ;;  %v630_v0 = vpack.c.bf16 %v442_v4, %v442_v4  ;;  %564 = vst.msk [vmem:[#allocation11] sm:$0xf] %vm563_vm3, %v629_v3 }
 0x282   :  { %744 = vmatmul.mubr.bf16.vlgmr.msra.gmra.mrb[4].mxu1 %v443_v5  ;;  %565 = vst.msk [vmem:[#allocation11 + $0x4] sm:$0xf] %vm563_vm3, %v630_v0 }
 0x283   :  { %889 = shalt.err (!%p886_p8)
}
 0x284   :  { %s890_s17 = scalar_lea.hbm %s1139_s9, 128 }
 0x285   :  { %p891_p9 = scmp.ne.s32.totalorder %s1139_s9, %s890_s17  ;;  %p894_p10 = scmp.lt.u32.totalorder %s890_s17, %s1139_s9 }
 0x287   :  { %p896_p11 = pnand %p894_p10, %p891_p9 }
 0x289   :  { %899 = shalt.err (!%p896_p11)
}
 0x28a   :  { %580 = dma.vmem_to_hbm [thread:$0]  %s575_s12, 128, %s1139_s9, [#allocation5], %s910_s25, %s910_s25, %s911_s26   ;;  %vm566_vm4 = vcmask 64512  }
 0x28b   :  { %v618_v6 = vld [vmem:[%s1138_s8] ss:$0 sm:$0xff] }
 0x355   :  { %v549_v7 = vpop.f32.mrb[4].mxu1 }
 0x356   :  { %v550_v8 = vadd.f32 %v618_v6, %v549_v7  ;;  %v745_v9 = vpop.f32.mrb[5].mxu1 }
 0x357   :  { %v552_v10 = vpop.f32.mrb[6].mxu1 }
 0x358   :  { %567 = vst.msk [vmem:[%s1140_s10] sm:$0xff] %vm566_vm4, %v550_v8  ;;  %v553_v11 = vadd.f32 %v618_v6, %v552_v10  ;;  %v746_v12 = vpop.f32.mrb[7].mxu1 }
 0x35a   :  { %568 = vst.msk [vmem:[%s1140_s10 + $0x8] sm:$0xff] %vm566_vm4, %v553_v11 }
 0x35b   :  { %906 = dma.done.wait [#allocation5], 128  }
 0x35c   :  { %907 = vsyncadd [#allocation5], 4294967168 }
 0x35d   :  { %588 = vsyncpa [#allocation4], 1 }
 0x35e   :  { %589 = vsyncpa [#allocation7], 1 }
 0x35f   :  { %590 = vsyncpa [#allocation10], 1 }
 0x360   :  { %591 = vsyncpa [#allocation5], 1 }

</bundles_post_ra>
